<compile_context>
chip_gen: v7x
topology: tpu7x:2x2x1
jax: 0.10.0
libtpu: 0.0.40
codegen_flags: <defaults>
</compile_context>

<pallas_src>
from typing import NamedTuple

import jax
import jax.numpy as jnp
from jax import lax
from jax.experimental import pallas as pl
from jax.experimental.pallas import tpu as pltpu


class QuantTensor(NamedTuple):
    """Minimal stand-in for brevitas.quant_tensor.QuantTensor (data wrapper)."""
    # TODO(synk): brevitas QuantTensor also carries scale / zero-point / bit-width
    # metadata; this stand-in is data-only.
    tensor: jax.Array


KH = KW = 3   # 3x3 conv
PAD = 1       # padding=1, stride=1


def _build_weight_slab(w, w_spatial, kseg):
    """(KH, KW, Cin, Cout) conv weights -> (KH*kseg, W*Cout) banded matmul slab.

    slab[kh*kseg + wp*Cin + ci, w*Cout + co] = w[kh, kw, ci, co] iff wp == w + kw,
    zero elsewhere (including the kseg-padding rows).  Built ONCE per spatial
    width and cached by the wrapper — never on the forward path.
    """
    khk, kwk, cin, cout = w.shape
    wp_len = w_spatial + 2 * PAD
    inpos = jnp.arange(wp_len)[:, None]          # (Wp, 1) padded input column
    outpos = jnp.arange(w_spatial)[None, :]      # (1, W)  output column
    blocks = []
    for kh in range(khk):
        blk = jnp.zeros((wp_len, w_spatial, cin, cout), w.dtype)
        for kw in range(kwk):
            mask = (inpos == outpos + kw).astype(w.dtype)            # (Wp, W)
            blk = blk + mask[:, :, None, None] * w[kh, kw][None, None]
        # (Wp, W, Cin, Cout) -> (Wp, Cin, W, Cout) -> (Wp*Cin, W*Cout)
        seg = jnp.transpose(blk, (0, 2, 1, 3)).reshape(wp_len * cin,
                                                       w_spatial * cout)
        seg = jnp.pad(seg, ((0, kseg - wp_len * cin), (0, 0)))   # 72 -> kseg rows
        blocks.append(seg)
    return jnp.concatenate(blocks, axis=0)       # (KH*kseg, W*Cout)


@jax.jit
def _conv3x3_forward_nchw(x_nchw, w_slab, b_row):
    """Jitted forward: NCHW in -> NCHW out. All glue fuses under jit."""
    N, Cin, H, W = x_nchw.shape
    Wp = W + 2 * PAD
    kseg = w_slab.shape[0] // KH      # 128-aligned per-kh lane segment
    L = w_slab.shape[1]               # W * Cout (lane-dense, multiple of 128 here)
    Cout = L // W

    # ---- fused layout glue: NCHW -> NHWC, spatial pad, pack+pad lanes ----
    # (kept NCHW at the module boundary for torch-Conv2d parity; under jit the
    #  transpose + pads + reshape collapse into a single copy)
    x = jnp.transpose(x_nchw, (0, 2, 3, 1))                          # (N,H,W,Cin)
    x = jnp.pad(x, ((0, 0), (PAD, PAD), (PAD, PAD), (0, 0)))         # (N,H+2,W+2,Cin)
    x = x.reshape(N, H + 2 * PAD, Wp * Cin)                          # (N,H+2,72)
    x = jnp.pad(x, ((0, 0), (0, 0), (0, kseg - Wp * Cin)))           # (N,H+2,128)

    def kernel(x_ref, w_ref, b_ref, o_ref, a_scr):
        # x_ref: (1, H+2, kseg)  one image's H-padded, lane-packed activation
        # w_ref: (KH*kseg, L)    banded block-Toeplitz weight slab (resident)
        # b_ref: (1, L)          bias replicated per output-w position
        # o_ref: (1, H, L)       lane-dense output block
        # a_scr: (H, KH*kseg)    im2col slab assembled in VMEM (no HBM dup)
        xwin = x_ref[0]                                   # (H+2, kseg), one load
        for kh in range(KH):
            # full-lane-width, 128-aligned segment writes (unmasked stores);
            # the zero lane-padding of x lines up with zero rows of w_slab.
            a_scr[:, pl.ds(kh * kseg, kseg)] = xwin[kh:kh + H, :]
        acc = jnp.dot(a_scr[...], w_ref[...],
                      preferred_element_type=jnp.float32)            # (H, L)
        o_ref[0] = (acc + b_ref[...]).astype(o_ref.dtype)

    out = pl.pallas_call(
        kernel,
        out_shape=jax.ShapeDtypeStruct((N, H, L), x_nchw.dtype),
        grid_spec=pltpu.PrefetchScalarGridSpec(
            num_scalar_prefetch=0,
            grid=(N,),                                    # batch axis -> 2 TCs on v7x
            in_specs=[
                pl.BlockSpec((1, H + 2 * PAD, kseg), lambda n: (n, 0, 0)),
                pl.BlockSpec((KH * kseg, L), lambda n: (0, 0)),   # stays resident
                pl.BlockSpec((1, L), lambda n: (0, 0)),
            ],
            out_specs=pl.BlockSpec((1, H, L), lambda n: (n, 0, 0)),
            scratch_shapes=[pltpu.VMEM((H, KH * kseg), x_nchw.dtype)],
        ),
        compiler_params=pltpu.CompilerParams(
            dimension_semantics=("parallel",)),
    )(x, w_slab, b_row)

    # (N, H, W*Cout) -> (N, Cout, H, W)
    return jnp.transpose(out.reshape(N, H, W, Cout), (0, 3, 1, 2))


class WrappedConv:
    """The `wrapped` module: Conv2d(Cin, Cout, k=3, padding=1, bias=True), NCHW."""

    def __init__(self, w, b):
        self.w = w  # (KH, KW, Cin, Cout)
        self.b = b  # (Cout,)
        self._cache = {}  # spatial width -> (w_slab, b_row), built once

    def _slabs(self, w_spatial):
        if w_spatial not in self._cache:
            cin, cout = self.w.shape[2], self.w.shape[3]
            wp_cin = (w_spatial + 2 * PAD) * cin
            kseg = ((wp_cin + 127) // 128) * 128          # pad per-kh K segment
            w_slab = _build_weight_slab(self.w, w_spatial, kseg)      # (KH*kseg, W*Cout)
            b_row = jnp.tile(self.b, w_spatial).reshape(1, w_spatial * cout)
            self._cache[w_spatial] = (jax.device_put(w_slab), jax.device_put(b_row))
        return self._cache[w_spatial]

    def __call__(self, x_nchw):
        w_slab, b_row = self._slabs(x_nchw.shape[3])
        return _conv3x3_forward_nchw(x_nchw, w_slab, b_row)


class QuantWrapper:
    """JAX/Pallas mirror of the PyTorch QuantWrapper module (pure glue)."""

    def __init__(self, wrapped, return_quant_tensor=True):
        self.wrapped = wrapped
        self.return_quant_tensor = return_quant_tensor

    def __call__(self, x):
        if isinstance(x, QuantTensor):
            x = x.tensor
        x = self.wrapped(x)
        if self.return_quant_tensor:
            x = QuantTensor(x)
        return x


if __name__ == "__main__":
    key = jax.random.PRNGKey(0)
    k_x, k_w, k_b = jax.random.split(key, 3)

    N, Cin, H, W = 2, 4, 16, 16
    Cout = 8

    x_nchw = jax.random.normal(k_x, (N, Cin, H, W), jnp.float32)
    w = jax.random.normal(k_w, (KH, KW, Cin, Cout), jnp.float32) * 0.1
    b = jax.random.normal(k_b, (Cout,), jnp.float32) * 0.1

    module = QuantWrapper(WrappedConv(w, b), return_quant_tensor=True)

    out = module(QuantTensor(x_nchw))
    y = jax.block_until_ready(out.tensor)  # (N, Cout, H, W)

    # Reference check against XLA's conv (same NCHW semantics as torch Conv2d).
    w_oihw = jnp.transpose(w, (3, 2, 0, 1))  # (Cout, Cin, KH, KW)
    ref = lax.conv_general_dilated(
        x_nchw, w_oihw, window_strides=(1, 1), padding=((1, 1), (1, 1)),
        dimension_numbers=("NCHW", "OIHW", "NCHW"),
    ) + b.reshape(1, Cout, 1, 1)

    assert y.shape == (N, Cout, H, W)
    assert jnp.allclose(y, ref, atol=1e-4, rtol=1e-4)
    print("KERNEL_OK")
</pallas_src>

<mosaic_0001>
module attributes {stable_mosaic.version = 11 : i64} {
  func.func @kernel(%arg0: i32, %arg1: memref<1x18x128xf32, #tpu.memory_space<vmem>>, %arg2: memref<384x128xf32, #tpu.memory_space<vmem>>, %arg3: memref<1x128xf32, #tpu.memory_space<vmem>>, %arg4: memref<1x16x128xf32, #tpu.memory_space<vmem>>, %arg5: memref<16x384xf32, #tpu.memory_space<vmem>>) attributes {dimension_semantics = [#tpu.dimension_semantics<parallel>], iteration_bounds = array<i64: 2>, scalar_prefetch = 0 : i64, scratch_operands = 1 : i64, tpu.core_type = #tpu.core_type<tc>, window_params = [{transform_indices = @transform_0, window_bounds = array<i64: 1, 18, 128>}, {pipeline_mode = #tpu.pipeline_mode<synchronous>, transform_indices = @transform_1, window_bounds = array<i64: 384, 128>}, {pipeline_mode = #tpu.pipeline_mode<synchronous>, transform_indices = @transform_2, window_bounds = array<i64: 1, 128>}, {transform_indices = @transform_3, window_bounds = array<i64: 1, 16, 128>}]} {
    %c0 = arith.constant 0 : index
    %c0_0 = arith.constant 0 : index
    %c0_1 = arith.constant 0 : index
    %0 = vector.load %arg1[%c0, %c0_0, %c0_1] : memref<1x18x128xf32, #tpu.memory_space<vmem>>, vector<1x18x128xf32>
    %1 = vector.shape_cast %0 : vector<1x18x128xf32> to vector<18x128xf32>
    %2 = vector.extract_strided_slice %1 {offsets = [0, 0], sizes = [16, 128], strides = [1, 1]} : vector<18x128xf32> to vector<16x128xf32>
    %c0_2 = arith.constant 0 : index
    %c0_3 = arith.constant 0 : index
    %3 = vector.load %arg5[%c0_2, %c0_3] : memref<16x384xf32, #tpu.memory_space<vmem>>, vector<16x128xf32>
    tpu.vector_store %arg5[%c0_2, %c0_3], %2 {strides = array<i32>} : memref<16x384xf32, #tpu.memory_space<vmem>>, vector<16x128xf32>,
    %4 = vector.extract_strided_slice %1 {offsets = [1, 0], sizes = [16, 128], strides = [1, 1]} : vector<18x128xf32> to vector<16x128xf32>
    %c0_4 = arith.constant 0 : index
    %c128 = arith.constant 128 : index
    %5 = vector.load %arg5[%c0_4, %c128] : memref<16x384xf32, #tpu.memory_space<vmem>>, vector<16x128xf32>
    tpu.vector_store %arg5[%c0_4, %c128], %4 {strides = array<i32>} : memref<16x384xf32, #tpu.memory_space<vmem>>, vector<16x128xf32>,
    %6 = vector.extract_strided_slice %1 {offsets = [2, 0], sizes = [16, 128], strides = [1, 1]} : vector<18x128xf32> to vector<16x128xf32>
    %c0_5 = arith.constant 0 : index
    %c256 = arith.constant 256 : index
    %7 = vector.load %arg5[%c0_5, %c256] : memref<16x384xf32, #tpu.memory_space<vmem>>, vector<16x128xf32>
    tpu.vector_store %arg5[%c0_5, %c256], %6 {strides = array<i32>} : memref<16x384xf32, #tpu.memory_space<vmem>>, vector<16x128xf32>,
    %c0_6 = arith.constant 0 : index
    %c0_7 = arith.constant 0 : index
    %8 = vector.load %arg5[%c0_6, %c0_7] : memref<16x384xf32, #tpu.memory_space<vmem>>, vector<16x384xf32>
    %c0_8 = arith.constant 0 : index
    %c0_9 = arith.constant 0 : index
    %9 = vector.load %arg2[%c0_8, %c0_9] : memref<384x128xf32, #tpu.memory_space<vmem>>, vector<384x128xf32>
    %cst = arith.constant dense<0.000000e+00> : vector<16x128xf32>
    %10 = tpu.matmul %8, %9, %cst {dimension_numbers = #tpu.dot_dimension_numbers<[1], [0], [0], [1], [0, 0, 1, 1], [], []>} : vector<16x384xf32>, vector<384x128xf32>, vector<16x128xf32> -> vector<16x128xf32>
    %c0_10 = arith.constant 0 : index
    %c0_11 = arith.constant 0 : index
    %11 = vector.load %arg3[%c0_10, %c0_11] : memref<1x128xf32, #tpu.memory_space<vmem>>, vector<1x128xf32>
    %12 = vector.broadcast %11 : vector<1x128xf32> to vector<16x128xf32>
    %13 = arith.addf %10, %12 : vector<16x128xf32>
    %c0_12 = arith.constant 0 : index
    %c0_13 = arith.constant 0 : index
    %c0_14 = arith.constant 0 : index
    %14 = vector.load %arg4[%c0_12, %c0_13, %c0_14] : memref<1x16x128xf32, #tpu.memory_space<vmem>>, vector<1x16x128xf32>
    %15 = vector.shape_cast %14 : vector<1x16x128xf32> to vector<16x128xf32>
    %16 = vector.shape_cast %13 : vector<16x128xf32> to vector<1x16x128xf32>
    tpu.vector_store %arg4[%c0_12, %c0_13, %c0_14], %16 {strides = array<i32>} : memref<1x16x128xf32, #tpu.memory_space<vmem>>, vector<1x16x128xf32>,
    return
  }
  func.func @transform_0(%arg0: i32) -> (i32, i32, i32) {
    %c0_i32 = arith.constant 0 : i32
    %c0_i32_0 = arith.constant 0 : i32
    %c0_i32_1 = arith.constant 0 : i32
    return %arg0, %c0_i32, %c0_i32_0 : i32, i32, i32
  }
  func.func @transform_1(%arg0: i32) -> (i32, i32) {
    %c0_i32 = arith.constant 0 : i32
    %c0_i32_0 = arith.constant 0 : i32
    %c0_i32_1 = arith.constant 0 : i32
    return %c0_i32, %c0_i32_0 : i32, i32
  }
  func.func @transform_2(%arg0: i32) -> (i32, i32) {
    %c0_i32 = arith.constant 0 : i32
    %c0_i32_0 = arith.constant 0 : i32
    %c0_i32_1 = arith.constant 0 : i32
    return %c0_i32, %c0_i32_0 : i32, i32
  }
  func.func @transform_3(%arg0: i32) -> (i32, i32, i32) {
    %c0_i32 = arith.constant 0 : i32
    %c0_i32_0 = arith.constant 0 : i32
    %c0_i32_1 = arith.constant 0 : i32
    return %arg0, %c0_i32, %c0_i32_0 : i32, i32, i32
  }
}

</mosaic_0001>

<bundles_post_ra>
// kernel: _conv3x3_forward_nchw.1
= control target key start
LH: loop header
LB: loop body
LE: loop exit
PB: predicated region body
PF: predicated region fallthrough
CT: control target
= control target key end

     0   :  { %s671_s12 = smov 0   ;;  %s854_s0 = inlined_call_operand.vmem [shape: f32[2,18,128], index: 0, kind: input, shape index: {}]   ;;  %s855_s1 = inlined_call_operand.vmem [shape: f32[384,128], index: 1, kind: input, shape index: {}]   ;;  %s856_s2 = inlined_call_operand.vmem [shape: f32[1,128], index: 2, kind: input, shape index: {}]   ;;  %s857_s3 = inlined_call_operand.vmem [shape: f32[2,16,128], index: 3, kind: output, shape index: {}]  }
   0x1 LB: > { %s467_s13 = sadd.s32 4294967295, %s649_s12   ;;  %p471_p0 = scmp.ge.s32.totalorder %s649_s12, 1  ;;  %s649_s12 = sphi %s671_s12, %s13_s12  }
   0x2   : > { %p137_p1 = scmp.lt.s32.totalorder %s649_s12, 3 }
   0x4   : > { %p138_p2 = pnand %p471_p0, %p137_p1 }
   0x5   : > { %v221_v0 = vld [vmem:[%s855_s1 + $0x80] sm:$0xff] (!%p138_p2)  ;;  %v222_v1 = vld [vmem:[%s855_s1 + $0x88] sm:$0xff] (!%p138_p2)  ;;  %p688_p3 = scmp.lt.s32.totalorder (!%p138_p2), %s467_s13, 1  ;;  %v223_v5 = vld [vmem:[%s855_s1 + $0x90] sm:$0xff] (!%p138_p2)  ;;  %vm179_vm0 = vcmask (!%p138_p2), 1046528   ;;  %vm189_vm1 = vcmask (!%p138_p2), 1045504  }
   0x6   : > { %141 = sbr.rel (%p138_p2) target bundleno = 264 (0x108), region = 32  ;;  %v205_v2 = vld [vmem:[%s855_s1] sm:$0xff] (!%p138_p2)  ;;  %v570_v3 = vpack.c.bf16 (!%p138_p2), %v222_v1, %v221_v0  ;;  %v206_v4 = vld [vmem:[%s855_s1 + $0x8] sm:$0xff] (!%p138_p2)  ;;  %v224_v6 = vld [vmem:[%s855_s1 + $0x98] sm:$0xff] (!%p138_p2) }
   0x7   : > { %v572_v7 = vpack.c.bf16 (!%p138_p2), %v206_v4, %v205_v2  ;;  %v574_v8 = vpack.c.bf16 (!%p138_p2), %v224_v6, %v223_v5  ;;  %v237_v9 = vld [vmem:[%s855_s1 + $0x100] sm:$0xff] (!%p138_p2)  ;;  %v238_v10 = vld [vmem:[%s855_s1 + $0x108] sm:$0xff] (!%p138_p2)  ;;  %v207_v11 = vld [vmem:[%s855_s1 + $0x10] sm:$0xff] (!%p138_p2) }
   0x8   : > { %571 = vmatprep.subr.bf16.mxu0 (!%p138_p2), %v570_v3  ;;  %v602_v12 = vpack.c.bf16 (!%p138_p2), %v238_v10, %v237_v9  ;;  %v208_v13 = vld [vmem:[%s855_s1 + $0x18] sm:$0xff] (!%p138_p2)  ;;  %v225_v14 = vld [vmem:[%s855_s1 + $0xa0] sm:$0xff] (!%p138_p2)  ;;  %v226_v15 = vld [vmem:[%s855_s1 + $0xa8] sm:$0xff] (!%p138_p2) }
   0x9   : > { %573 = vmatpush3.bf16.msra.mxu0 (!%p138_p2), %v572_v7  ;;  %v576_v16 = vpack.c.bf16 (!%p138_p2), %v208_v13, %v207_v11  ;;  %v239_v17 = vld [vmem:[%s855_s1 + $0x110] sm:$0xff] (!%p138_p2)  ;;  %v240_v18 = vld [vmem:[%s855_s1 + $0x118] sm:$0xff] (!%p138_p2)  ;;  %v578_v19 = vpack.c.bf16 (!%p138_p2), %v226_v15, %v225_v14  ;;  %v209_v21 = vld [vmem:[%s855_s1 + $0x20] sm:$0xff] (!%p138_p2) }
   0xa   : > { %575 = vmatprep.subr.bf16.mxu0 (!%p138_p2), %v574_v8  ;;  %603 = vmatprep.subr.bf16.mxu1 (!%p138_p2), %v602_v12  ;;  %v606_v20 = vpack.c.bf16 (!%p138_p2), %v240_v18, %v239_v17  ;;  %v210_v22 = vld [vmem:[%s855_s1 + $0x28] sm:$0xff] (!%p138_p2)  ;;  %v227_v23 = vld [vmem:[%s855_s1 + $0xb0] sm:$0xff] (!%p138_p2)  ;;  %v228_v24 = vld [vmem:[%s855_s1 + $0xb8] sm:$0xff] (!%p138_p2) }
   0xb   : > { %605 = vmatpush3.bf16.msra.mxu1 (!%p138_p2), %v602_v12  ;;  %v241_v25 = vld [vmem:[%s855_s1 + $0x120] sm:$0xff] (!%p138_p2)  ;;  %v242_v26 = vld [vmem:[%s855_s1 + $0x128] sm:$0xff] (!%p138_p2)  ;;  %v580_v28 = vpack.c.bf16 (!%p138_p2), %v210_v22, %v209_v21  ;;  %v243_v29 = vld [vmem:[%s855_s1 + $0x130] sm:$0xff] (!%p138_p2)  ;;  %v582_v31 = vpack.c.bf16 (!%p138_p2), %v228_v24, %v227_v23 }
   0xc   : > { %607 = vmatprep.subr.bf16.mxu1 (!%p138_p2), %v606_v20  ;;  %v610_v27 = vpack.c.bf16 (!%p138_p2), %v242_v26, %v241_v25  ;;  %v244_v30 = vld [vmem:[%s855_s1 + $0x138] sm:$0xff] (!%p138_p2)  ;;  %v211_v32 = vld [vmem:[%s855_s1 + $0x30] sm:$0xff] (!%p138_p2)  ;;  %v229_v34 = vld [vmem:[%s855_s1 + $0xc0] sm:$0xff] (!%p138_p2) }
   0xd   : > { %s860_s13 = smov (!%p688_p3, %s467_s13), 1  ;;  %577 = vmatpush3.bf16.msra.mxu0 %v576_v16  ;;  %v212_v33 = vld [vmem:[%s855_s1 + $0x38] sm:$0xff]  ;;  %v230_v35 = vld [vmem:[%s855_s1 + $0xc8] sm:$0xff]  ;;  %v614_v36 = vpack.c.bf16 %v244_v30, %v243_v29  ;;  %v245_v38 = vld [vmem:[%s855_s1 + $0x140] sm:$0xff] }
   0xe   : > { %s634_s7 = smul.u32 24, %s860_s13  ;;  %579 = vmatprep.subr.bf16.mxu0 %v578_v19  ;;  %v584_v37 = vpack.c.bf16 %v212_v33, %v211_v32  ;;  %v246_v39 = vld [vmem:[%s855_s1 + $0x148] sm:$0xff]  ;;  %v586_v40 = vpack.c.bf16 %v230_v35, %v229_v34  ;;  %v213_v41 = vld [vmem:[%s855_s1 + $0x40] sm:$0xff]  ;;  %v231_v43 = vld [vmem:[%s855_s1 + $0xd0] sm:$0xff]  ;;  %s478_s17 = sshll.u32 %s860_s13, 4 }
   0xf   : > { %609 = vmatpush3.bf16.msra.mxu1 %v606_v20  ;;  %v214_v42 = vld [vmem:[%s855_s1 + $0x48] sm:$0xff]  ;;  %v232_v44 = vld [vmem:[%s855_s1 + $0xd8] sm:$0xff]  ;;  %v618_v45 = vpack.c.bf16 %v246_v39, %v245_v38  ;;  %v247_v49 = vld [vmem:[%s855_s1 + $0x150] sm:$0xff]  ;;  %s170_s21 = scalar_lea.vmem %s857_s3, %s478_s17 }
  0x10   : > { %611 = vmatprep.subr.bf16.mxu1 %v610_v27  ;;  %s775_s20 = scalar_lea.vmem %s854_s0, %s634_s7  ;;  %v588_v48 = vpack.c.bf16 %v214_v42, %v213_v41  ;;  %v248_v50 = vld [vmem:[%s855_s1 + $0x158] sm:$0xff]  ;;  %v590_v53 = vpack.c.bf16 %v232_v44, %v231_v43  ;;  %v215_v54 = vld [vmem:[%s855_s1 + $0x50] sm:$0xff]  ;;  %v233_v58 = vld [vmem:[%s855_s1 + $0xe0] sm:$0xff] }
  0x11   : > { %581 = vmatpush3.bf16.msra.mxu0 %v580_v28  ;;  %v171_v46 = vld [vmem:[%s775_s20] sm:$0xff]  ;;  %v172_v47 = vld [vmem:[%s775_s20 + $0x8] sm:$0xff]  ;;  %v216_v55 = vld [vmem:[%s855_s1 + $0x58] sm:$0xff]  ;;  %v622_v61 = vpack.c.bf16 %v248_v50, %v247_v49 }
  0x12   : > { %583 = vmatprep.subr.bf16.mxu0 %v582_v31  ;;  %v180_v51 = vrot.slane %v171_v46, 1  ;;  %v181_v52 = vrot.slane %v172_v47, 1  ;;  %v190_v56 = vrot.slane %v171_v46, 2  ;;  %v191_v57 = vrot.slane %v172_v47, 2  ;;  %v234_v59 = vld [vmem:[%s855_s1 + $0xe8] sm:$0xff]  ;;  %v249_v0 = vld [vmem:[%s855_s1 + $0x160] sm:$0xff] }
  0x13   : > { %613 = vmatpush3.bf16.msra.mxu1 %v610_v27  ;;  %v592_v63 = vpack.c.bf16 %v216_v55, %v215_v54  ;;  %v250_v1 = vld [vmem:[%s855_s1 + $0x168] sm:$0xff]  ;;  %v594_v2 = vpack.c.bf16 %v234_v59, %v233_v58  ;;  %v217_v3 = vld [vmem:[%s855_s1 + $0x60] sm:$0xff]  ;;  %v235_v5 = vld [vmem:[%s855_s1 + $0xf0] sm:$0xff] }
  0x14   : > { %615 = vmatprep.subr.bf16.mxu1 %v614_v36  ;;  %v182_v60 = vsel %vm179_vm0, %v180_v51, %v181_v52  ;;  %v192_v62 = vsel %vm189_vm1, %v190_v56, %v191_v57  ;;  %v218_v4 = vld [vmem:[%s855_s1 + $0x68] sm:$0xff]  ;;  %v236_v6 = vld [vmem:[%s855_s1 + $0xf8] sm:$0xff]  ;;  %v626_v7 = vpack.c.bf16 %v250_v1, %v249_v0  ;;  %v251_v9 = vld [vmem:[%s855_s1 + $0x170] sm:$0xff] }
  0x15   : > { %585 = vmatpush3.bf16.msra.mxu0 %v584_v37  ;;  %324 = vmatprep.mubr.f32.mxu0 %v182_v60  ;;  %v596_v8 = vpack.c.bf16 %v218_v4, %v217_v3  ;;  %v252_v10 = vld [vmem:[%s855_s1 + $0x178] sm:$0xff]  ;;  %v598_v11 = vpack.c.bf16 %v236_v6, %v235_v5  ;;  %v219_v12 = vld [vmem:[%s855_s1 + $0x70] sm:$0xff]  ;;  %v475_v23 = vld [vmem:[%s856_s2] ss:$0 sm:$0xff] }
  0x16   : > { %587 = vmatprep.subr.bf16.mxu0 %v586_v40  ;;  %567 = vmatprep.mubr.f32.mxu1 %v192_v62  ;;  %v220_v13 = vld [vmem:[%s855_s1 + $0x78] sm:$0xff]  ;;  %v173_v14 = vld [vmem:[%s775_s20 + $0x10] sm:$0x3]  ;;  %v630_v15 = vpack.c.bf16 %v252_v10, %v251_v9 }
  0x17   : > { %617 = vmatpush3.bf16.msra.mxu1 %v614_v36  ;;  %v600_v16 = vpack.c.bf16 %v220_v13, %v219_v12  ;;  %v183_v17 = vrot.slane %v173_v14, 1  ;;  %v193_v18 = vrot.slane %v173_v14, 2 }
  0x18   : > { %619 = vmatprep.subr.bf16.mxu1 %v618_v45 }
  0x19   : > { %589 = vmatpush3.bf16.msra.mxu0 %v588_v48  ;;  %v184_v19 = vsel %vm179_vm0, %v181_v52, %v183_v17  ;;  %v194_v20 = vsel %vm189_vm1, %v191_v57, %v193_v18 }
  0x1a   : > { %591 = vmatprep.subr.bf16.mxu0 %v590_v53 }
  0x1b   : > { %621 = vmatpush3.bf16.msra.mxu1 %v618_v45 }
  0x1c   : > { %623 = vmatprep.subr.bf16.mxu1 %v622_v61 }
  0x1d   : > { %593 = vmatpush3.bf16.msra.mxu0 %v592_v63 }
  0x1e   : > { %595 = vmatprep.subr.bf16.mxu0 %v594_v2 }
  0x1f   : > { %625 = vmatpush3.bf16.msra.mxu1 %v622_v61 }
  0x20   : > { %627 = vmatprep.subr.bf16.mxu1 %v626_v7 }
  0x21   : > { %597 = vmatpush3.bf16.msra.mxu0 %v596_v8 }
  0x22   : > { %599 = vmatprep.subr.bf16.mxu0 %v598_v11 }
  0x23   : > { %629 = vmatpush3.bf16.msra.mxu1 %v626_v7 }
  0x24   : > { %631 = vmatprep.subr.bf16.mxu1 %v630_v15 }
  0x25   : > { %601 = vmatpush3.bf16.msra.mxu0 %v600_v16 }
  0x27   : > { %633 = vmatpush3.bf16.msra.mxu1 %v630_v15 }
  0x28   : > { %325 = vmatmul.mubr.f32.vlgmr.msra.gmra.mrb[0].mxu0 %v171_v46 }
  0x29   : > { %329 = vmatprep.mubr.f32.mxu0 %v184_v19 }
  0x2a   : > { %568 = vmatmul.mubr.f32.vlgmr.msra.gmra.mrb[0].mxu1 %v194_v20 }
  0x2c   : > { %330 = vmatmul.mubr.f32.gmra.mrb[2].mxu0 %v172_v47 }
  0xfb   : > { %v511_v21 = vpop.f32.mrb[0].mxu0 }
  0xfc   : > { %v512_v22 = vpop.f32.mrb[1].mxu0 }
  0xfd   : > { %v513_v24 = vadd.f32 %v512_v22, %v511_v21  ;;  %v569_v25 = vpop.f32.mrb[0].mxu1 }
  0xfe   : > { %v401_v26 = vpop.f32.mrb[1].mxu1 }
  0xff   : > { %v514_v27 = vpop.f32.mrb[2].mxu0  ;;  %v327_v28 = vadd.f32 %v513_v24, %v475_v23 }
 0x100   : > { %v515_v29 = vpop.f32.mrb[3].mxu0 }
 0x101   : > { %v516_v30 = vadd.f32 %v515_v29, %v514_v27  ;;  %v402_v31 = vadd.f32 %v401_v26, %v327_v28 }
 0x103   : > { %v332_v32 = vadd.f32 %v516_v30, %v475_v23  ;;  %410 = vst [vmem:[%s170_s21] sm:$0xff] %v402_v31 }
 0x105   : > { %v407_v33 = vadd.f32 %v569_v25, %v332_v32 }
 0x107   : > { %411 = vst [vmem:[%s170_s21 + $0x8] sm:$0xff] %v407_v33 }
 0x108 PF: > { %s13_s12 = sadd.s32 1, %s649_s12  }
 0x109   : > { %p10_p4 = scmp.ge.s32.totalorder %s13_s12, 4  }
 0x10b   :  { %12 = sbr.rel (!%p10_p4) target bundleno = 1 (0x1), region = 62 }

</bundles_post_ra>
